<compile_context>
chip_gen: v7x
topology: tpu7x:2x2x1
jax: 0.10.0
libtpu: 0.0.40
codegen_flags: <defaults>
</compile_context>

<pallas_src>
import functools

import jax
import jax.numpy as jnp
from jax.experimental import pallas as pl
from jax.experimental.pallas import tpu as pltpu

_LANES = 128
_LANE_TILE_BYTES = 4 * 1024 * 1024   # target per-buffer footprint, lane path
_MIN_SPLIT_BYTES = 2 * 1024 * 1024   # force >=2 grid steps above this (megacore)
_ROWS_TILE_BYTES = 2 * 1024 * 1024   # per-buffer footprint cap, fallback path
_VMEM_LIMIT = 32 * 1024 * 1024       # above v5e's 16 MiB scoped default, within
                                     # every generation's physical VMEM


# ---------------------------------------------------------------------------
# Fast path: 128 % D == 0  ->  lane-dense (rows, 128) layout.
# ---------------------------------------------------------------------------
def _nme_lane_kernel(x_ref, t_ref, o_ref, *, d, tile_rows, valid_rows, ragged):
    # x_ref, t_ref: (tile_rows, 128) native dtype.  o_ref: (1, 1, 128) f32.
    diff = x_ref[...].astype(jnp.float32) - t_ref[...].astype(jnp.float32)
    sq = diff * diff                                       # VPU
    # Sum each point's D consecutive lanes onto its anchor lane (lane % d == 0)
    # with log2(d) roll+adds (XLU slot; d is a power of two since d | 128).
    grp = sq
    s = 1
    while s < d:
        # A static shift of (128 - s) == shift of -s: lane j picks up lane j+s.
        grp = grp + pltpu.roll(grp, _LANES - s, axis=1)
        s *= 2
    dist = jnp.sqrt(grp)                                   # EUP
    if d > 1:
        # (1, 128) mask, broadcast by the select: keep anchor lanes only.
        lane = jax.lax.broadcasted_iota(jnp.int32, (1, _LANES), 1)
        dist = jnp.where((lane & (d - 1)) == 0, dist, 0.0)
    if ragged:
        # Drop garbage rows of the ragged last tile (select also kills NaN/Inf).
        row = jax.lax.broadcasted_iota(jnp.int32, (tile_rows, 1), 0)
        glob = pl.program_id(0) * tile_rows + row
        dist = jnp.where(glob < valid_rows, dist, 0.0)
    # Lane-dense per-tile partial sum (reduce over the sublane axis only).
    o_ref[...] = jnp.sum(dist, axis=0, keepdims=True).reshape(1, 1, _LANES)


def _nme_lane_path(x, t, d):
    n = x.size
    itemsize = jnp.dtype(x.dtype).itemsize
    xf = x.reshape(-1)   # free reshape (contiguous row-major)
    tf = t.reshape(-1)

    rem = n % _LANES
    if rem:
        # TODO(synk): a fully zero-copy handling of n % 128 != 0 needs a manual
        # pl.ANY + make_async_copy path with a shorter final chunk; this <128-
        # element pad still costs one extra pass over the inputs in that case.
        pad = _LANES - rem
        xf = jnp.pad(xf, (0, pad))
        tf = jnp.pad(tf, (0, pad))
    rows = -(-n // _LANES)

    # Dtype-aware tile: ~4 MiB per pipeline buffer (8192 rows f32, 16384 bf16).
    bytes_per_row = _LANES * itemsize
    tile_rows = max(8, (_LANE_TILE_BYTES // bytes_per_row) // 8 * 8)
    # Multi-MiB inputs: force >=2 grid steps so both v7x TCs get work.
    if rows * bytes_per_row > _MIN_SPLIT_BYTES:
        half = -(-rows // 2)
        half = -(-half // 8) * 8
        tile_rows = min(tile_rows, half)
    if rows <= tile_rows:
        tile_rows = rows          # single full-extent block (no (8,128) issue)
    num_tiles = -(-rows // tile_rows)
    ragged = (rows % tile_rows) != 0

    x2 = xf.reshape(rows, _LANES)
    t2 = tf.reshape(rows, _LANES)

    kernel = functools.partial(_nme_lane_kernel, d=d, tile_rows=tile_rows,
                               valid_rows=rows, ragged=ragged)
    return pl.pallas_call(
        kernel,
        out_shape=jax.ShapeDtypeStruct((num_tiles, 1, _LANES), jnp.float32),
        grid=(num_tiles,),
        in_specs=[
            pl.BlockSpec((tile_rows, _LANES), lambda i: (i, 0)),
            pl.BlockSpec((tile_rows, _LANES), lambda i: (i, 0)),
        ],
        out_specs=pl.BlockSpec((1, 1, _LANES), lambda i: (i, 0, 0)),
        compiler_params=pltpu.CompilerParams(
            dimension_semantics=("parallel",),
            vmem_limit_bytes=_VMEM_LIMIT),
    )(x2, t2)


# ---------------------------------------------------------------------------
# Fallback: general D  ->  row-tiled (tile_m, D), reduced fully in-kernel.
# ---------------------------------------------------------------------------
def _nme_rows_kernel(x_ref, t_ref, o_ref, *, tile_m, valid_m, ragged):
    diff = x_ref[...].astype(jnp.float32) - t_ref[...].astype(jnp.float32)
    dist = jnp.sqrt(jnp.sum(diff * diff, axis=-1, keepdims=True))  # (tile_m, 1)
    if ragged:
        row = jax.lax.broadcasted_iota(jnp.int32, dist.shape, 0)
        glob = pl.program_id(0) * tile_m + row
        dist = jnp.where(glob < valid_m, dist, 0.0)
    partial = jnp.sum(dist)                                        # scalar f32
    lane = jax.lax.broadcasted_iota(jnp.int32, (1, 1, _LANES), 2)
    o_ref[...] = jnp.where(lane == 0, partial, 0.0)                # lane-dense


def _nme_rows_path(x, t, d):
    m = x.size // d
    itemsize = jnp.dtype(x.dtype).itemsize
    x2 = x.reshape(m, d)   # free reshape; no host-side padding at all
    t2 = t.reshape(m, d)

    # Size the tile by its *padded* VMEM footprint: a (tile_m, d) block pads to
    # 128 lanes in VMEM regardless of d.
    lanes_padded = -(-d // _LANES) * _LANES
    bytes_per_row = lanes_padded * itemsize
    tile_m = max(8, (_ROWS_TILE_BYTES // bytes_per_row) // 8 * 8)
    if m <= tile_m:
        tile_m = m
    num_tiles = -(-m // tile_m)
    ragged = (m % tile_m) != 0

    kernel = functools.partial(_nme_rows_kernel, tile_m=tile_m, valid_m=m,
                               ragged=ragged)
    return pl.pallas_call(
        kernel,
        out_shape=jax.ShapeDtypeStruct((num_tiles, 1, _LANES), jnp.float32),
        grid=(num_tiles,),
        in_specs=[
            pl.BlockSpec((tile_m, d), lambda i: (i, 0)),
            pl.BlockSpec((tile_m, d), lambda i: (i, 0)),
        ],
        out_specs=pl.BlockSpec((1, 1, _LANES), lambda i: (i, 0, 0)),
        compiler_params=pltpu.CompilerParams(
            dimension_semantics=("parallel",),
            vmem_limit_bytes=_VMEM_LIMIT),
    )(x2, t2)


def nme(input, target):
    """Mean over all points of the L2 distance along the last axis."""
    assert input.shape == target.shape
    d = input.shape[-1]
    m = input.size // d              # true point count for the mean

    if 0 < d <= _LANES and _LANES % d == 0:
        partials = _nme_lane_path(input, target, d)
    else:
        partials = _nme_rows_path(input, target, d)
    # Tiny finalize in the wrapper: sum the per-tile partials, divide by true M.
    return jnp.sum(partials) / jnp.float32(m)


if __name__ == "__main__":
    key = jax.random.PRNGKey(0)
    k1, k2, k3, k4, k5, k6, k7, k8 = jax.random.split(key, 8)

    # 1) Landmark-style inputs: (batch=2, num_points=8, coord_dim=2).
    x = jax.random.normal(k1, (2, 8, 2), dtype=jnp.float32)
    t = jax.random.normal(k2, (2, 8, 2), dtype=jnp.float32)
    res = nme(x, t)
    jax.block_until_ready(res)
    ref = jnp.mean(jnp.sqrt(jnp.sum((x - t) ** 2, axis=-1)))
    assert jnp.allclose(res, ref, atol=1e-5, rtol=1e-5), (res, ref)

    # 2) bf16 input: exercises the dtype-aware lane-dense path.
    xb = jax.random.normal(k3, (32, 8192, 2), dtype=jnp.bfloat16)
    tb = jax.random.normal(k4, (32, 8192, 2), dtype=jnp.bfloat16)
    res_b = nme(xb, tb)
    jax.block_until_ready(res_b)
    ref_b = jnp.mean(jnp.sqrt(jnp.sum(
        (xb.astype(jnp.float32) - tb.astype(jnp.float32)) ** 2, axis=-1)))
    assert jnp.allclose(res_b, ref_b, atol=1e-3, rtol=1e-3), (res_b, ref_b)

    # 3) f32 input large enough to force >=2 grid steps with a ragged last
    #    tile: exercises the in-kernel row masking that replaced host padding.
    xr = jax.random.normal(k5, (41, 6400, 2), dtype=jnp.float32)
    tr = jax.random.normal(k6, (41, 6400, 2), dtype=jnp.float32)
    res_r = nme(xr, tr)
    jax.block_until_ready(res_r)
    ref_r = jnp.mean(jnp.sqrt(jnp.sum((xr - tr) ** 2, axis=-1)))
    assert jnp.allclose(res_r, ref_r, atol=1e-4, rtol=1e-4), (res_r, ref_r)

    # 4) D=3 exercises the general-D fallback path (in-kernel reduction).
    x3 = jax.random.normal(k7, (2, 8, 3), dtype=jnp.float32)
    t3 = jax.random.normal(k8, (2, 8, 3), dtype=jnp.float32)
    res3 = nme(x3, t3)
    jax.block_until_ready(res3)
    ref3 = jnp.mean(jnp.sqrt(jnp.sum((x3 - t3) ** 2, axis=-1)))
    assert jnp.allclose(res3, ref3, atol=1e-5, rtol=1e-5), (res3, ref3)

    print("KERNEL_OK")
</pallas_src>

<mosaic_0001>
module attributes {stable_mosaic.version = 11 : i64} {
  func.func @_nme_lane_kernel(%arg0: i32, %arg1: memref<1x128xf32, #tpu.memory_space<vmem>>, %arg2: memref<1x128xf32, #tpu.memory_space<vmem>>, %arg3: memref<1x1x128xf32, #tpu.memory_space<vmem>>) attributes {dimension_semantics = [#tpu.dimension_semantics<parallel>], iteration_bounds = array<i64: 1>, scalar_prefetch = 0 : i64, scratch_operands = 0 : i64, tpu.core_type = #tpu.core_type<tc>, window_params = [{transform_indices = @transform_0, window_bounds = array<i64: 1, 128>}, {transform_indices = @transform_1, window_bounds = array<i64: 1, 128>}, {transform_indices = @transform_2, window_bounds = array<i64: 1, 1, 128>}]} {
    %c0 = arith.constant 0 : index
    %c0_0 = arith.constant 0 : index
    %0 = vector.load %arg1[%c0, %c0_0] : memref<1x128xf32, #tpu.memory_space<vmem>>, vector<1x128xf32>
    %c0_1 = arith.constant 0 : index
    %c0_2 = arith.constant 0 : index
    %1 = vector.load %arg2[%c0_1, %c0_2] : memref<1x128xf32, #tpu.memory_space<vmem>>, vector<1x128xf32>
    %2 = arith.subf %0, %1 : vector<1x128xf32>
    %3 = arith.mulf %2, %2 : vector<1x128xf32>
    %c127_i32 = arith.constant 127 : i32
    %4 = tpu.dynamic_rotate %3 by %c127_i32 dim 1 : vector<1x128xf32>, i32 -> vector<1x128xf32>
    %5 = arith.addf %3, %4 : vector<1x128xf32>
    %6 = math.sqrt %5 : vector<1x128xf32>
    %7 = tpu.iota {dimensions = array<i32: 1>} : vector<1x128xi32>
    %c1_i32 = arith.constant 1 : i32
    %8 = vector.broadcast %c1_i32 : i32 to vector<1x128xi32>
    %9 = arith.andi %7, %8 : vector<1x128xi32>
    %c0_i32 = arith.constant 0 : i32
    %10 = vector.broadcast %c0_i32 : i32 to vector<1x128xi32>
    %11 = arith.cmpi eq, %9, %10 : vector<1x128xi32>
    %cst = arith.constant 0.000000e+00 : f32
    %12 = vector.broadcast %cst : f32 to vector<1x128xf32>
    %13 = arith.select %11, %6, %12 : vector<1x128xi1>, vector<1x128xf32>
    %cst_3 = arith.constant dense<0.000000e+00> : vector<128xf32>
    %14 = vector.multi_reduction <add>, %13, %cst_3 [0] : vector<1x128xf32> to vector<128xf32>
    %15 = vector.shape_cast %14 : vector<128xf32> to vector<1x128xf32>
    %16 = vector.shape_cast %15 : vector<1x128xf32> to vector<1x1x128xf32>
    %c0_4 = arith.constant 0 : index
    %c0_5 = arith.constant 0 : index
    %c0_6 = arith.constant 0 : index
    %17 = vector.load %arg3[%c0_4, %c0_5, %c0_6] : memref<1x1x128xf32, #tpu.memory_space<vmem>>, vector<1x1x128xf32>
    tpu.vector_store %arg3[%c0_4, %c0_5, %c0_6], %16 {strides = array<i32>} : memref<1x1x128xf32, #tpu.memory_space<vmem>>, vector<1x1x128xf32>,
    return
  }
  func.func @transform_0(%arg0: i32) -> (i32, i32) {
    %c0_i32 = arith.constant 0 : i32
    %c0_i32_0 = arith.constant 0 : i32
    return %arg0, %c0_i32 : i32, i32
  }
  func.func @transform_1(%arg0: i32) -> (i32, i32) {
    %c0_i32 = arith.constant 0 : i32
    %c0_i32_0 = arith.constant 0 : i32
    return %arg0, %c0_i32 : i32, i32
  }
  func.func @transform_2(%arg0: i32) -> (i32, i32, i32) {
    %c0_i32 = arith.constant 0 : i32
    %c0_i32_0 = arith.constant 0 : i32
    %c0_i32_1 = arith.constant 0 : i32
    return %arg0, %c0_i32, %c0_i32_0 : i32, i32, i32
  }
}

</mosaic_0001>

<bundles_post_ra>
// kernel: tpu_custom_call.1
= control target key start
LH: loop header
LB: loop body
LE: loop exit
PB: predicated region body
PF: predicated region fallthrough
CT: control target
= control target key end

     0   :  { %7 = vsyncpa [#allocation3], 0  ;;  %s158_s0 = inlined_call_operand.hbm [shape: f32[1,128], index: 0, kind: input, shape index: {}]   ;;  %s159_s1 = inlined_call_operand.vmem [shape: f32[1,128], index: 1, kind: input, shape index: {}]   ;;  %s160_s2 = inlined_call_operand.hbm [shape: f32[1,1,128], index: 2, kind: output, shape index: {}]  }
   0x1   :  { %8 = vsyncpa [#allocation4], 0  ;;  %s113_s9 = smov [#allocation2]   ;;  %s65_s13 = scalar_lea.hbm %s158_s0, 16 }
   0x2   :  { %s15_s10 = sshll.u32 %s113_s9, 4  ;;  %p66_p0 = scmp.ne.s32.totalorder %s158_s0, %s65_s13  ;;  %s16_s10 = int_to_ptr.vmem [resolvable:$true] %s15_s10 }
   0x3   :  { %p69_p1 = scmp.lt.u32.totalorder %s65_s13, %s158_s0 }
   0x5   :  { %p71_p2 = pnand %p69_p1, %p66_p0 }
   0x7   :  { %74 = shalt.err (!%p71_p2)
}
   0x8   :  { %s75_s18 = scalar_lea.vmem %s16_s10, 16  ;;  %s79_s19 = scalar_lea.vmem %s16_s10, 32 }
   0x9   :  { %p76_p3 = scmp.ne.s32.totalorder %s16_s10, %s75_s18  ;;  %p80_p4 = scmp.lt.s32.totalorder %s16_s10, %s16_s10 }
   0xa   :  { %p81_p5 = scmp.lt.s32.totalorder %s79_s19, %s75_s18 }
   0xc   :  { %p82_p6 = por %p81_p5, %p80_p4 }
   0xe   :  { %p83_p7 = pnand %p82_p6, %p76_p3 }
  0x10   :  { %86 = shalt.err (!%p83_p7)
}
  0x11   :  { %18 = dma.hbm_to_vmem [thread:$0]  %s158_s0, 16, %s16_s10, [#allocation3]  }
  0x12   :  { %109 = dma.done.wait [#allocation3], 16  }
  0x13   :  { %110 = vsyncadd [#allocation3], 4294967280  ;;  %v24_v0 = vld [vmem:[#allocation2] sm:$0x1]  ;;  %s114_s24 = smov 127   ;;  %v38_v6 = vlaneseq  ;;  %s115_s0 = smov [#allocation5]  }
  0x14   :  { %v25_v1 = vld [vmem:[%s159_s1] sm:$0x1]  ;;  %s51_s25 = sshll.u32 %s115_s0, 4  ;;  %s52_s25 = int_to_ptr.vmem [resolvable:$true] %s51_s25 }
  0x15   :  { %v26_v2 = vsub.f32 %v24_v0, %v25_v1  ;;  %v39_v7 = vand.u32 127, %v38_v6  ;;  %s87_s1 = scalar_lea.vmem %s52_s25, 16  ;;  %s91_s26 = scalar_lea.vmem %s52_s25, 32 }
  0x16   :  { %p88_p8 = scmp.ne.s32.totalorder %s52_s25, %s87_s1  ;;  %p92_p9 = scmp.lt.s32.totalorder %s52_s25, %s52_s25 }
  0x17   :  { %v27_v3 = vmul.f32 %v26_v2, %v26_v2  ;;  %v40_v8 = vand.u32 1, %v39_v7  ;;  %p93_p10 = scmp.lt.s32.totalorder %s91_s26, %s87_s1 }
  0x19   :  { %28 = vrot.lane.b32.xlu0 %v27_v3, %s114_s24  ;;  %vm41_vm1 = vcmp.eq.s32.totalorder %v40_v8, 0  ;;  %p94_p11 = por %p93_p10, %p92_p9 }
  0x1b   :  { %p95_p12 = pnand %p94_p11, %p88_p8 }
  0x8b   :  { %v29_v4 = vpop.permute.xlu0 %28 }
  0x8c   :  { %v30_v5 = vadd.f32 %v29_v4, %v27_v3 }
  0x8e   :  { %63 = vrsqrt.f32 %v30_v5  ;;  %vm33_vm0 = vcmp.eq.f32.partialorder %v30_v5, inf  ;;  %v36_v11 = vand.u32 2147483648, %v30_v5  ;;  %vm35_vm2 = vcmp.eq.f32.partialorder %v30_v5, 0.0 }
  0x98   :  { %v64_v9 = vpop.eup %63 }
  0x99   :  { %v32_v10 = vmul.f32 %v64_v9, %v30_v5 }
  0x9b   :  { %v34_v12 = vsel %vm33_vm0, %v30_v5, %v32_v10 }
  0x9c   :  { %v37_v13 = vsel %vm35_vm2, %v36_v11, %v34_v12 }
  0x9d   :  { %v42_v14 = vsel %vm41_vm1, %v37_v13, 0.0 }
  0x9e   :  { %44 = vst [vmem:[#allocation5] sm:$0x1] %v42_v14 }
  0x9f   :  { %98 = shalt.err (!%p95_p12)
}
  0xa0   :  { %s99_s29 = scalar_lea.hbm %s160_s2, 16 }
  0xa1   :  { %p100_p13 = scmp.ne.s32.totalorder %s160_s2, %s99_s29  ;;  %p103_p0 = scmp.lt.u32.totalorder %s99_s29, %s160_s2 }
  0xa3   :  { %p105_p1 = pnand %p103_p0, %p100_p13 }
  0xa5   :  { %108 = shalt.err (!%p105_p1)
}
  0xa6   :  { %54 = dma.vmem_to_hbm [thread:$0]  %s52_s25, 16, %s160_s2, [#allocation4]  }
  0xa7   :  { %111 = dma.done.wait [#allocation4], 16  }
  0xa8   :  { %112 = vsyncadd [#allocation4], 4294967280 }
  0xa9   :  { %58 = vsyncpa [#allocation3], 1 }
  0xaa   :  { %59 = vsyncpa [#allocation4], 1 }

</bundles_post_ra>
